<compile_context>
chip_gen: v5e
topology: v5e:2x2
jax: 0.10.0
libtpu: 0.0.40
codegen_flags: <defaults>
</compile_context>

<pallas_src>
import jax
import jax.numpy as jnp
from jax.experimental import pallas as pl
from jax.experimental.pallas import tpu as pltpu


def _attention_kernel(q_ref, k_ref, v_ref, m_ref, ctx_ref, attn_ref):
    # Blocks: q (bt,1,D), k (bt,T,D), v (bt,T,Dv), m (bt,T) int32
    #         ctx (bt,1,Dv), attn (bt,T)
    bt, T, D = k_ref.shape
    scale = 1.0 / (float(D) ** 0.5)

    # Fold 1/sqrt(dk) into q (bt*D elements, cheaper than scaling energy).
    q = q_ref[...] * scale                                   # (bt, 1, D)

    # energy[b, 0, t] = sum_d q[b,0,d] * k[b,t,d]  (MXU batched contraction).
    energy = jnp.einsum(
        "bqd,bkd->bqk", q, k_ref[...],
        preferred_element_type=jnp.float32)                  # (bt, 1, T) f32

    # Pack batch rows into sublanes: dense (bt, T) layout for the whole
    # mask/softmax/output path (8x fewer vector ops + dense attn stores).
    energy = energy.reshape(bt, T)                           # (bt, T) f32

    # masked_fill(mask == 0, -inf)  (a fully-masked row yields NaN, exactly
    # like the PyTorch reference).
    energy = jnp.where(m_ref[...] == 0, -jnp.inf, energy)

    # softmax along T in f32 (exact divide; denom is only (bt,1)).
    e_max = jnp.max(energy, axis=-1, keepdims=True)          # (bt, 1)
    ex = jnp.exp(energy - e_max)                             # (bt, T)
    denom = jnp.sum(ex, axis=-1, keepdims=True)              # (bt, 1)
    attn = ex / denom                                        # (bt, T) f32

    attn_ref[...] = attn.astype(attn_ref.dtype)              # dense (bt,T) store

    # context[b, 0, d] = sum_t attn[b,t] * v[b,t,d]  (MXU batched contraction).
    ctx = jnp.einsum(
        "bqk,bkd->bqd",
        attn.reshape(bt, 1, T).astype(v_ref.dtype), v_ref[...],
        preferred_element_type=jnp.float32)                  # (bt, 1, Dv)
    ctx_ref[...] = ctx.astype(ctx_ref.dtype)

    # TODO(synk): nn.Dropout path omitted (module constructed with dropout=None / eval mode).


def _vmem_capacity_bytes():
    """Physical VMEM of the local chip; conservative fallback if unavailable."""
    try:
        info = pltpu.get_tpu_info()
        cap = getattr(info, "vmem_capacity_bytes", None)
        if cap:
            return int(cap)
    except Exception:
        pass
    return 64 << 20   # v7x per-TC size: safe lower bound for all generations


def _is_multi_tensorcore_chip():
    """Best-effort: does ("parallel",) sharding buy a second TensorCore?"""
    try:
        info = pltpu.get_tpu_info()
        for name in ("num_cores", "num_tensorcores", "tensorcores_per_chip",
                     "cores_per_chip"):
            n = getattr(info, name, None)
            if n is not None:
                return int(n) > 1
    except Exception:
        pass
    try:
        kind = jax.devices()[0].device_kind.lower()
        return ("7" in kind) or ("v4" in kind) or ("v5p" in kind)
    except Exception:
        return False


def _choose_block_b(B, T, D, Dv, key_dtype, value_dtype, io_dtype,
                    vmem_limit_bytes, multi_tc):
    """Batch rows per grid step, sized against the scoped VMEM limit."""
    kb = jnp.dtype(key_dtype).itemsize
    vb = jnp.dtype(value_dtype).itemsize
    ob = jnp.dtype(io_dtype).itemsize
    # Streamed, double-buffered bytes per batch row (K/V dominate).
    stream = 2 * (T * D * kb + T * Dv * vb          # key, value tiles
                  + D * ob + T * 4                  # q, int32 mask
                  + Dv * ob + T * ob)               # ctx, attn outputs
    # f32 intermediates: the (bt,1,T) MXU energy may be sublane-padded (x8)
    # if it round-trips VMEM, plus the dense 2-D energy/ex/attn working set.
    inter = (8 + 4) * T * 4
    budget = int(vmem_limit_bytes * 0.75)           # headroom for compiler scratch
    bt = max(1, budget // (stream + inter))

    if multi_tc and B >= 16:
        # Only on multi-TC chips: keep >= 2 grid steps so ("parallel",) can
        # shard across both TensorCores.  On 1-TC chips this would only shrink
        # the tile and add a grid step.
        bt = min(bt, pl.cdiv(B, 2))

    bt = min(bt, B)
    if bt < B:
        bt = max(8, (bt // 8) * 8)                  # sublane-friendly 2-D blocks
        bt = min(bt, B)
    return int(bt)


def attention(query, key, value, mask, *, block_b=None):
    """Pallas equivalent of Attention.forward (dropout=None).

    query: (B, D), key: (B, T, D), value: (B, T, Dv), mask: (B, T) nonzero=keep.
    Returns (context (B, Dv), attn (B, T)).
    """
    B, D = query.shape
    _, T, _ = key.shape
    Dv = value.shape[-1]

    vmem_cap = _vmem_capacity_bytes()
    vmem_limit = (vmem_cap * 3) // 4                # ~96 MiB v5e/v6e, ~48 MiB v7x

    if block_b is None:
        bt = _choose_block_b(B, T, D, Dv, key.dtype, value.dtype, query.dtype,
                             vmem_limit, _is_multi_tensorcore_chip())
    else:
        bt = int(block_b)
    bt = max(1, min(bt, B))
    if bt < B:
        # keep the second-minor dim of the 2-D mask/attn blocks a multiple of 8
        bt = max(8, (bt // 8) * 8)
        bt = min(bt, B)
    nb = pl.cdiv(B, bt)   # partial last block handled by Pallas masking: no K/V pad copy

    q3 = query.reshape(B, 1, D)                     # free metadata reshape
    m2 = mask.astype(jnp.int32)                     # dense arbitrary-mask semantics kept

    ctx3, attn = pl.pallas_call(
        _attention_kernel,
        out_shape=(
            jax.ShapeDtypeStruct((B, 1, Dv), query.dtype),
            jax.ShapeDtypeStruct((B, T), query.dtype),
        ),
        grid_spec=pltpu.PrefetchScalarGridSpec(
            num_scalar_prefetch=0,
            grid=(nb,),
            in_specs=[
                pl.BlockSpec((bt, 1, D), lambda b: (b, 0, 0)),
                pl.BlockSpec((bt, T, D), lambda b: (b, 0, 0)),
                pl.BlockSpec((bt, T, Dv), lambda b: (b, 0, 0)),
                pl.BlockSpec((bt, T), lambda b: (b, 0)),
            ],
            out_specs=[
                pl.BlockSpec((bt, 1, Dv), lambda b: (b, 0, 0)),
                pl.BlockSpec((bt, T), lambda b: (b, 0)),
            ],
        ),
        compiler_params=pltpu.CompilerParams(
            dimension_semantics=("parallel",),
            vmem_limit_bytes=int(vmem_limit),
        ),
    )(q3, key, value, m2)

    return ctx3.reshape(B, Dv), attn


def _reference(query, key, value, mask):
    dk = query.shape[-1]
    energy = jnp.einsum("bd,btd->bt", query, key) / jnp.sqrt(jnp.float32(dk))
    energy_m = jnp.where(mask == 0, -jnp.inf, energy)
    attn = jax.nn.softmax(energy_m, axis=-1)
    context = jnp.einsum("bt,btv->bv", attn, value)
    return context, attn


if __name__ == "__main__":
    rng = jax.random.PRNGKey(0)

    # --- test 1: small shapes, default (single-block) path -------------------
    B, T, D, Dv = 4, 8, 32, 32
    k1, k2, k3, k4 = jax.random.split(rng, 4)
    query = jax.random.normal(k1, (B, D), dtype=jnp.float32)
    key = jax.random.normal(k2, (B, T, D), dtype=jnp.float32)
    value = jax.random.normal(k3, (B, T, Dv), dtype=jnp.float32)
    lens = jnp.array([6, 8, 3, 5], dtype=jnp.int32)
    mask = (jnp.arange(T)[None, :] < lens[:, None]).astype(jnp.int32)

    ref_ctx, ref_attn = _reference(query, key, value, mask)
    ctx, attn = attention(query, key, value, mask)
    jax.block_until_ready((ctx, attn))
    assert jnp.allclose(ctx, ref_ctx, atol=2e-5, rtol=1e-5)
    assert jnp.allclose(attn, ref_attn, atol=2e-5, rtol=1e-5)

    # --- test 2: multi-step grid with a partial (unpadded) last block --------
    B2 = 12
    q2 = jax.random.normal(k4, (B2, D), dtype=jnp.float32)
    kk2 = jax.random.normal(k2, (B2, T, D), dtype=jnp.float32)
    vv2 = jax.random.normal(k3, (B2, T, Dv), dtype=jnp.float32)
    lens2 = jnp.array([6, 8, 3, 5, 1, 7, 8, 2, 4, 6, 8, 5], dtype=jnp.int32)
    mask2 = (jnp.arange(T)[None, :] < lens2[:, None]).astype(jnp.int32)

    ref_ctx2, ref_attn2 = _reference(q2, kk2, vv2, mask2)
    ctx2, attn2 = attention(q2, kk2, vv2, mask2, block_b=8)   # grid=(2,), ragged tail
    jax.block_until_ready((ctx2, attn2))
    assert jnp.allclose(ctx2, ref_ctx2, atol=2e-5, rtol=1e-5)
    assert jnp.allclose(attn2, ref_attn2, atol=2e-5, rtol=1e-5)

    print("KERNEL_OK")
</pallas_src>

<mosaic_0001>
module attributes {stable_mosaic.version = 11 : i64} {
  func.func @_attention_kernel(%arg0: i32, %arg1: memref<4x1x32xf32, #tpu.memory_space<vmem>>, %arg2: memref<4x8x32xf32, #tpu.memory_space<vmem>>, %arg3: memref<4x8x32xf32, #tpu.memory_space<vmem>>, %arg4: memref<4x8xi32, #tpu.memory_space<vmem>>, %arg5: memref<4x1x32xf32, #tpu.memory_space<vmem>>, %arg6: memref<4x8xf32, #tpu.memory_space<vmem>>) attributes {dimension_semantics = [#tpu.dimension_semantics<parallel>], iteration_bounds = array<i64: 1>, scalar_prefetch = 0 : i64, scratch_operands = 0 : i64, tpu.core_type = #tpu.core_type<tc>, window_params = [{transform_indices = @transform_0, window_bounds = array<i64: 4, 1, 32>}, {transform_indices = @transform_1, window_bounds = array<i64: 4, 8, 32>}, {transform_indices = @transform_2, window_bounds = array<i64: 4, 8, 32>}, {transform_indices = @transform_3, window_bounds = array<i64: 4, 8>}, {transform_indices = @transform_4, window_bounds = array<i64: 4, 1, 32>}, {transform_indices = @transform_5, window_bounds = array<i64: 4, 8>}]} {
    %c0 = arith.constant 0 : index
    %c0_0 = arith.constant 0 : index
    %c0_1 = arith.constant 0 : index
    %0 = vector.load %arg1[%c0, %c0_0, %c0_1] : memref<4x1x32xf32, #tpu.memory_space<vmem>>, vector<4x1x32xf32>
    %cst = arith.constant 0.176776692 : f32
    %1 = vector.broadcast %cst : f32 to vector<4x1x32xf32>
    %2 = arith.mulf %0, %1 : vector<4x1x32xf32>
    %c0_2 = arith.constant 0 : index
    %c0_3 = arith.constant 0 : index
    %c0_4 = arith.constant 0 : index
    %3 = vector.load %arg2[%c0_2, %c0_3, %c0_4] : memref<4x8x32xf32, #tpu.memory_space<vmem>>, vector<4x8x32xf32>
    "tpu.trace_start"() <{level = 10 : i32, message = "bqd,bkd->bqk"}> : () -> ()
    %cst_5 = arith.constant dense<0.000000e+00> : vector<4x1x8xf32>
    %4 = tpu.matmul %2, %3, %cst_5 {dimension_numbers = #tpu.dot_dimension_numbers<[2], [2], [1], [1], [0, 0, 0, 1, 1, 1], [0], [0]>} : vector<4x1x32xf32>, vector<4x8x32xf32>, vector<4x1x8xf32> -> vector<4x1x8xf32>
    "tpu.trace_stop"() : () -> ()
    %5 = vector.shape_cast %4 : vector<4x1x8xf32> to vector<4x8xf32>
    %c0_6 = arith.constant 0 : index
    %c0_7 = arith.constant 0 : index
    %6 = vector.load %arg4[%c0_6, %c0_7] : memref<4x8xi32, #tpu.memory_space<vmem>>, vector<4x8xi32>
    %c0_i32 = arith.constant 0 : i32
    %7 = vector.broadcast %c0_i32 : i32 to vector<4x8xi32>
    %8 = arith.cmpi eq, %6, %7 : vector<4x8xi32>
    %cst_8 = arith.constant 0xFF800000 : f32
    %9 = vector.broadcast %cst_8 : f32 to vector<4x8xf32>
    %10 = arith.select %8, %9, %5 : vector<4x8xi1>, vector<4x8xf32>
    %cst_9 = arith.constant dense<0xFF800000> : vector<4xf32>
    %11 = vector.multi_reduction <maximumf>, %10, %cst_9 [1] : vector<4x8xf32> to vector<4xf32>
    %12 = vector.shape_cast %11 : vector<4xf32> to vector<4x1xf32>
    %13 = vector.broadcast %12 : vector<4x1xf32> to vector<4x8xf32>
    %14 = arith.subf %10, %13 : vector<4x8xf32>
    %15 = math.exp %14 : vector<4x8xf32>
    %cst_10 = arith.constant dense<0.000000e+00> : vector<4xf32>
    %16 = vector.multi_reduction <add>, %15, %cst_10 [1] : vector<4x8xf32> to vector<4xf32>
    %17 = vector.shape_cast %16 : vector<4xf32> to vector<4x1xf32>
    %18 = vector.broadcast %17 : vector<4x1xf32> to vector<4x8xf32>
    %19 = arith.divf %15, %18 : vector<4x8xf32>
    %c0_11 = arith.constant 0 : index
    %c0_12 = arith.constant 0 : index
    %20 = vector.load %arg6[%c0_11, %c0_12] : memref<4x8xf32, #tpu.memory_space<vmem>>, vector<4x8xf32>
    tpu.vector_store %arg6[%c0_11, %c0_12], %19 {strides = array<i32>} : memref<4x8xf32, #tpu.memory_space<vmem>>, vector<4x8xf32>,
    %21 = vector.shape_cast %19 : vector<4x8xf32> to vector<4x1x8xf32>
    %c0_13 = arith.constant 0 : index
    %c0_14 = arith.constant 0 : index
    %c0_15 = arith.constant 0 : index
    %22 = vector.load %arg3[%c0_13, %c0_14, %c0_15] : memref<4x8x32xf32, #tpu.memory_space<vmem>>, vector<4x8x32xf32>
    "tpu.trace_start"() <{level = 10 : i32, message = "bqk,bkd->bqd"}> : () -> ()
    %cst_16 = arith.constant dense<0.000000e+00> : vector<4x1x32xf32>
    %23 = tpu.matmul %21, %22, %cst_16 {dimension_numbers = #tpu.dot_dimension_numbers<[2], [1], [1], [2], [0, 0, 0, 1, 1, 2], [0], [0]>} : vector<4x1x8xf32>, vector<4x8x32xf32>, vector<4x1x32xf32> -> vector<4x1x32xf32>
    "tpu.trace_stop"() : () -> ()
    %c0_17 = arith.constant 0 : index
    %c0_18 = arith.constant 0 : index
    %c0_19 = arith.constant 0 : index
    %24 = vector.load %arg5[%c0_17, %c0_18, %c0_19] : memref<4x1x32xf32, #tpu.memory_space<vmem>>, vector<4x1x32xf32>
    tpu.vector_store %arg5[%c0_17, %c0_18, %c0_19], %23 {strides = array<i32>} : memref<4x1x32xf32, #tpu.memory_space<vmem>>, vector<4x1x32xf32>,
    return
  }
  func.func @transform_0(%arg0: i32) -> (i32, i32, i32) {
    %c0_i32 = arith.constant 0 : i32
    %c0_i32_0 = arith.constant 0 : i32
    %c0_i32_1 = arith.constant 0 : i32
    return %arg0, %c0_i32, %c0_i32_0 : i32, i32, i32
  }
  func.func @transform_1(%arg0: i32) -> (i32, i32, i32) {
    %c0_i32 = arith.constant 0 : i32
    %c0_i32_0 = arith.constant 0 : i32
    %c0_i32_1 = arith.constant 0 : i32
    return %arg0, %c0_i32, %c0_i32_0 : i32, i32, i32
  }
  func.func @transform_2(%arg0: i32) -> (i32, i32, i32) {
    %c0_i32 = arith.constant 0 : i32
    %c0_i32_0 = arith.constant 0 : i32
    %c0_i32_1 = arith.constant 0 : i32
    return %arg0, %c0_i32, %c0_i32_0 : i32, i32, i32
  }
  func.func @transform_3(%arg0: i32) -> (i32, i32) {
    %c0_i32 = arith.constant 0 : i32
    %c0_i32_0 = arith.constant 0 : i32
    return %arg0, %c0_i32 : i32, i32
  }
  func.func @transform_4(%arg0: i32) -> (i32, i32, i32) {
    %c0_i32 = arith.constant 0 : i32
    %c0_i32_0 = arith.constant 0 : i32
    %c0_i32_1 = arith.constant 0 : i32
    return %arg0, %c0_i32, %c0_i32_0 : i32, i32, i32
  }
  func.func @transform_5(%arg0: i32) -> (i32, i32) {
    %c0_i32 = arith.constant 0 : i32
    %c0_i32_0 = arith.constant 0 : i32
    return %arg0, %c0_i32 : i32, i32
  }
}

</mosaic_0001>

<bundles_post_ra>
// kernel: tpu_custom_call.1
= control target key start
LH: loop header
LB: loop body
LE: loop exit
PB: predicated region body
PF: predicated region fallthrough
CT: control target
= control target key end

     0   :  { %11 = vsyncpa [#allocation3], 0  ;;  %s636_s0 = inlined_call_operand.hbm [shape: f32[4,1,32], index: 0, kind: input, shape index: {}]   ;;  %s637_s1 = inlined_call_operand.hbm [shape: f32[4,8,32], index: 1, kind: input, shape index: {}]   ;;  %s638_s2 = inlined_call_operand.hbm [shape: f32[4,8,32], index: 2, kind: input, shape index: {}]   ;;  %s639_s3 = inlined_call_operand.hbm [shape: s32[4,8], index: 3, kind: input, shape index: {}]   ;;  %s640_s4 = inlined_call_operand.hbm [shape: f32[4,1,32], index: 4, kind: output, shape index: {0}]   ;;  %s641_s5 = inlined_call_operand.hbm [shape: f32[4,8], index: 5, kind: output, shape index: {1}]  }
   0x1   :  { %12 = vsyncpa [#allocation6], 0 }
   0x2   :  { %13 = vsyncpa [#allocation9], 0 }
   0x3   :  { %14 = vsyncpa [#allocation4], 0  ;;  %s33_s20 = sshll.u32 %s637_s1, 4  ;;  %s34_s20 = int_to_ptr.hbm [resolvable:$true] %s33_s20 }
   0x4   :  { %15 = vsyncpa [#allocation12], 0  ;;  %s561_s21 = smov [#allocation5]   ;;  %s20_s25 = sshll.u32 %s636_s0, 4  ;;  %s21_s25 = int_to_ptr.hbm [resolvable:$true] %s20_s25 }
   0x5   :  { %s35_s22 = sshll.u32 %s561_s21, 4  ;;  %s562_s26 = smov 128   ;;  %s36_s22 = int_to_ptr.vmem [resolvable:$true] %s35_s22 }
   0x6   :  { %s563_s27 = smov 8   ;;  %s564_s28 = smov [#allocation2]  }
   0x7   :  { %41 = dma.hbm_to_vmem [thread:$0]  %s34_s20, 512, %s36_s22, [#allocation6], %s562_s26, %s562_s26, %s563_s27  }
   0x8   :  { %s22_s29 = sshll.u32 %s564_s28, 4  ;;  %s565_s30 = smov 16   ;;  %s23_s29 = int_to_ptr.vmem [resolvable:$true] %s22_s29 }
   0x9   :  { %s566_s6 = smov 1   ;;  %s46_s8 = sshll.u32 %s638_s2, 4  ;;  %s47_s8 = int_to_ptr.hbm [resolvable:$true] %s46_s8 }
   0xa   :  { %28 = dma.hbm_to_vmem [thread:$0]  %s21_s25, 64, %s23_s29, [#allocation3], %s565_s30, %s565_s30, %s566_s6  }
   0xb   :  { %s567_s9 = smov [#allocation7]   ;;  %s60_s12 = sshll.u32 %s639_s3, 4  ;;  %s61_s12 = int_to_ptr.hbm [resolvable:$true] %s60_s12 }
   0xc   :  { %s48_s0 = sshll.u32 %s567_s9, 4  ;;  %s568_s13 = smov [#allocation8]   ;;  %s49_s0 = int_to_ptr.vmem [resolvable:$true] %s48_s0 }
   0xd   :  { %54 = dma.hbm_to_vmem [thread:$0]  %s47_s8, 512, %s49_s0, [#allocation6], %s562_s26, %s562_s26, %s563_s27  }
   0xe   :  { %s62_s14 = sshll.u32 %s568_s13, 4  ;;  %s63_s14 = int_to_ptr.vmem [resolvable:$true] %s62_s14 }
   0xf   :  { %65 = dma.hbm_to_vmem [thread:$0]  %s61_s12, 64, %s63_s14, [#allocation9]  }
  0x10   :  { %551 = dma.done.wait [#allocation3], 64  }
  0x11   :  { %552 = vsyncadd [#allocation3], 4294967232 }
  0x12   :  { %553 = dma.done.wait [#allocation6], 1024  }
  0x13   :  { %554 = vsyncadd [#allocation6], 4294966272 }
  0x14   :  { %555 = dma.done.wait [#allocation9], 64  }
  0x15   :  { %556 = vsyncadd [#allocation9], 4294967232  ;;  %vm94_vm0 = vcmask 261120   ;;  %v92_v0 = vld [vmem:[#allocation5 + $0x10] sm:$0xff]  ;;  %v93_v1 = vld [vmem:[#allocation5 + $0x18] sm:$0xff]  ;;  %vm206_vm1 = vcmask 1041409  }
  0x16   :  { %v84_v2 = vld [vmem:[#allocation2 + $0x2] sm:$0x1]  ;;  %385 = vmatpush.xpose.msk.msra.mxu2 %vm94_vm0, %v92_v0  ;;  %387 = vmatpush.xpose.msk.msra.mxu3 %vm94_vm0, %v93_v1  ;;  %v85_v4 = vld [vmem:[#allocation2 + $0x3] sm:$0x1]  ;;  %v91_v5 = vld [vmem:[#allocation5 + $0x8] sm:$0xff]  ;;  %vm209_vm2 = vcmask 1042434  }
  0x17   :  { %v88_v3 = vmul.f32 0.17677669, %v84_v2  ;;  %v90_v6 = vld [vmem:[#allocation5] sm:$0xff]  ;;  %v89_v7 = vmul.f32 0.17677669, %v85_v4  ;;  %383 = vmatpush.xpose.msk.msra.mxu1 %vm94_vm0, %v91_v5  ;;  %vm212_vm3 = vcmask 1043459  }
  0x18   :  { %381 = vmatpush.xpose.msk.msra.mxu0 %vm94_vm0, %v90_v6  ;;  %v83_v8 = vld [vmem:[#allocation2 + $0x1] sm:$0x1]  ;;  %v82_v9 = vld [vmem:[#allocation2] sm:$0x1]  ;;  %v199_v15 = vld [vmem:[#allocation8] sm:$0xf] }
  0x19   :  { %v87_v10 = vmul.f32 0.17677669, %v83_v8  ;;  %v86_v11 = vmul.f32 0.17677669, %v82_v9  ;;  %386 = vmatmul.msk.f32.vlgmr.msra.gmra.mxu2 %vm94_vm0, %v88_v3  ;;  %388 = vmatmul.msk.f32.vlgmr.msra.gmra.mxu3 %vm94_vm0, %v89_v7  ;;  %vm200_vm4 = vcmp.eq.s32.totalorder %v199_v15, 0  ;;  %vm216_vm5 = vcmask 60416  }
  0x1a   :  { %v246_v30 = vld [vmem:[#allocation7] sm:$0xff]  ;;  %v248_v31 = vld [vmem:[#allocation7 + $0x10] sm:$0xff]  ;;  %v249_v32 = vld [vmem:[#allocation7 + $0x18] sm:$0xff]  ;;  %vm250_vm10 = vcmask 64512   ;;  %s569_s2 = smov [#allocation11]   ;;  %s364_s17 = sshll.u32 %s641_s5, 4  ;;  %s365_s17 = int_to_ptr.hbm [resolvable:$true] %s364_s17 }
  0x1b   :  { %384 = vmatmul.msk.f32.vlgmr.msra.gmra.mxu1 %vm94_vm0, %v87_v10  ;;  %382 = vmatmul.msk.f32.vlgmr.msra.gmra.mxu0 %vm94_vm0, %v86_v11  ;;  %v247_v33 = vld [vmem:[#allocation7 + $0x8] sm:$0xff]  ;;  %s362_s3 = sshll.u32 %s569_s2, 4  ;;  %vm339_vm11 = vcmask 253952   ;;  %s570_s18 = smov [#allocation10]   ;;  %s363_s3 = int_to_ptr.vmem [resolvable:$true] %s362_s3 }
  0x1c   :  { %268 = vmatpush.msrb.mxu0 %v246_v30  ;;  %312 = vmatpush.msrb.mxu2 %v248_v31  ;;  %s348_s19 = sshll.u32 %s570_s18, 4  ;;  %s350_s22 = sshll.u32 %s640_s4, 4  ;;  %s349_s19 = int_to_ptr.vmem [resolvable:$true] %s348_s19  ;;  %s351_s22 = int_to_ptr.hbm [resolvable:$true] %s350_s22 }
  0x1d   :  { %334 = vmatpush.msrb.mxu3 %v249_v32  ;;  %290 = vmatpush.msrb.mxu1 %v247_v33 }
  0x98   :  { %v144_v12 = vpop.f32.mrf.mxu1  ;;  %v118_v14 = vpop.f32.mrf.mxu0 }
  0x99   :  { %v205_v13 = vrot.slane %v144_v12, 7 }
  0x9b   :  { %v207_v17 = vsel %vm206_vm1, %v205_v13, %v118_v14 }
  0x9c   :  { %v170_v16 = vpop.f32.mrf.mxu2  ;;  %v196_v18 = vpop.f32.mrf.mxu3 }
  0x9d   :  { %v208_v19 = vrot.slane %v170_v16, 6  ;;  %v211_v20 = vrot.slane %v196_v18, 5 }
  0x9f   :  { %v210_v21 = vsel %vm209_vm2, %v208_v19, %v207_v17 }
  0xa0   :  { %v213_v22 = vsel %vm212_vm3, %v211_v20, %v210_v21 }
  0xa1   :  { %v215_v23 = vsel %vm200_vm4, -inf, %v213_v22 }
  0xa2   :  { %v217_v24 = vsel %vm216_vm5, %v215_v23, -inf }
  0xa3   :  { %218 = vmax.xlane.f32.xlu0 %v217_v24 }
 0x116   :  { %v219_v25 = vpop.xlane.xlu0 %218 }
 0x117   :  { %v220_v26 = vsub.f32 %v215_v23, %v219_v25 }
 0x119   :  { %v221_v27 = vmul.f32 1.442695, %v220_v26 }
 0x11b   :  { %403 = vpow2.f32 %v221_v27 }
 0x121   :  { %v404_v28 = vpop.eup %403 }
 0x122   :  { %v223_v29 = vsel %vm216_vm5, %v404_v28, 0.0 }
 0x123   :  { %224 = vadd.xlane.f32.xlu0 %v223_v29 }
 0x196   :  { %v225_v34 = vpop.xlane.xlu0 %224 }
 0x197   :  { %405 = vrcp.f32 %v225_v34  ;;  %v237_v38 = vand.u32 2147483648, %v225_v34  ;;  %v235_v40 = vand.u32 2147483647, %v225_v34  ;;  %vm231_vm7 = vweird.f32 %v225_v34 }
 0x199   :  { %v238_v42 = vor.u32 1.1754944e-38, %v237_v38  ;;  %vm236_vm9 = vcmp.eq.f32.partialorder %v235_v40, 8.507059e+37 }
 0x19d   :  { %v406_v35 = vpop.eup %405 }
 0x19e   :  { %v227_v36 = vmul.f32 %v406_v35, %v225_v34  ;;  %vm232_vm6 = vweird.f32 %v406_v35 }
 0x19f   :  { %vm233_vm8 = vmor %vm231_vm7, %vm232_vm6 }
 0x1a0   :  { %v228_v37 = vsub.f32 1.0, %v227_v36 }
 0x1a2   :  { %v229_v39 = vmul.f32 %v406_v35, %v228_v37 }
 0x1a4   :  { %v230_v41 = vadd.f32 %v406_v35, %v229_v39 }
 0x1a6   :  { %v234_v43 = vsel %vm233_vm8, %v406_v35, %v230_v41 }
 0x1a7   :  { %v239_v44 = vsel %vm236_vm9, %v238_v42, %v234_v43 }
 0x1a8   :  { %v240_v45 = vmul.f32 %v404_v28, %v239_v44 }
 0x1aa   :  { %241 = vst.msk [vmem:[#allocation11] sm:$0xf] %vm216_vm5, %v240_v45  ;;  %389 = vmatmul.msk.f32.vlgmr.msrb.gmra.mxu0 %vm250_vm10, %v240_v45  ;;  %v243_v46 = vrot.slane %v240_v45, 1  ;;  %v244_v47 = vrot.slane %v240_v45, 2  ;;  %v245_v48 = vrot.slane %v240_v45, 3 }
 0x1ab   :  { %367 = dma.vmem_to_hbm [thread:$0]  %s363_s3, 64, %s365_s17, [#allocation12]  }
 0x1ac   :  { %390 = vmatmul.msk.f32.vlgmr.msrb.gmra.mxu1 %vm250_vm10, %v243_v46  ;;  %391 = vmatmul.msk.f32.vlgmr.msrb.gmra.mxu2 %vm250_vm10, %v244_v47 }
 0x1ad   :  { %392 = vmatmul.msk.f32.vlgmr.msrb.gmra.mxu3 %vm250_vm10, %v245_v48 }
 0x227   :  { %v270_v49 = vpop.f32.mrf.mxu0 }
 0x228   :  { %340 = vst.msk [vmem:[#allocation10] sm:$0x1] %vm339_vm11, %v270_v49 }
 0x229   :  { %v292_v50 = vpop.f32.mrf.mxu1 }
 0x22a   :  { %341 = vst.msk [vmem:[#allocation10 + $0x1] sm:$0x1] %vm339_vm11, %v292_v50 }
 0x22f   :  { %v314_v51 = vpop.f32.mrf.mxu2 }
 0x230   :  { %342 = vst.msk [vmem:[#allocation10 + $0x2] sm:$0x1] %vm339_vm11, %v314_v51  ;;  %v336_v52 = vpop.f32.mrf.mxu3 }
 0x231   :  { %343 = vst.msk [vmem:[#allocation10 + $0x3] sm:$0x1] %vm339_vm11, %v336_v52 }
 0x232   :  { %356 = dma.vmem_to_hbm [thread:$0]  %s349_s19, 64, %s351_s22, [#allocation4], %s565_s30, %s565_s30, %s566_s6  }
 0x233   :  { %557 = dma.done.wait [#allocation4], 64  }
 0x234   :  { %558 = vsyncadd [#allocation4], 4294967232 }
 0x235   :  { %559 = dma.done.wait [#allocation12], 64  }
 0x236   :  { %560 = vsyncadd [#allocation12], 4294967232 }
 0x237   :  { %376 = vsyncpa [#allocation3], 1 }
 0x238   :  { %377 = vsyncpa [#allocation6], 1 }
 0x239   :  { %378 = vsyncpa [#allocation9], 1 }
 0x23a   :  { %379 = vsyncpa [#allocation4], 1 }
 0x23b   :  { %380 = vsyncpa [#allocation12], 1 }

</bundles_post_ra>
